<compile_context>
chip_gen: v5e
topology: v5e:2x2
jax: 0.10.0
libtpu: 0.0.40
codegen_flags: <defaults>
</compile_context>

<pallas_src>
import jax
import jax.numpy as jnp
from jax import lax
from jax.experimental import pallas as pl
from jax.experimental.pallas import tpu as pltpu

F_PAD = 128   # lane-dense feature padding (last dim of x / h / weights / biases)
SUB = 16      # node / cluster sublane padding (bf16-friendly multiple of 16)


def _round_up(v, m):
    return ((v + m - 1) // m) * m


# ----------------------------- fused forward kernel ---------------------------

def _make_fused_kernel(block_meta):
    """Whole network forward in one kernel.  block_meta: list of dicts with
    num_layers, true_n, n_pad, true_k, k_pad (all static Python ints)."""

    def kernel(*refs):
        idx = 0
        adj_ref = refs[idx]; idx += 1
        x_ref = refs[idx]; idx += 1
        blocks = []
        for meta in block_meta:
            layers = []
            for _ in range(meta["num_layers"]):
                layers.append((refs[idx], refs[idx + 1]))
                idx += 2
            wpool_ref = refs[idx]; idx += 1
            blocks.append((layers, wpool_ref))
        xout_ref, loss_ref = refs[idx], refs[idx + 1]

        h = x_ref[...]                 # (n_pad, F_PAD) f32
        adj = adj_ref[...]             # (n_pad, n_pad) f32 row-normalised A_hat
        total_loss = jnp.float32(0.0)

        for b, meta in enumerate(block_meta):
            true_n, n_pad = meta["true_n"], meta["n_pad"]
            true_k, k_pad = meta["true_k"], meta["k_pad"]
            layers, wpool_ref = blocks[b]

            # ||A||^2 first so the f32 adjacency can die and only the bf16 copy
            # stays live through the matmul chain (vreg pressure).
            a_sq = jnp.sum(adj * adj)
            adj_bf = adj.astype(jnp.bfloat16)

            # ---- embedding GCN stack: h <- relu(A_hat @ h @ W + b) ----------
            for (w_ref, b_ref) in layers:
                ah = jnp.dot(adj_bf, h.astype(jnp.bfloat16),
                             preferred_element_type=jnp.float32)
                h = jnp.maximum(
                    jnp.dot(ah.astype(jnp.bfloat16), w_ref[...],
                            preferred_element_type=jnp.float32) + b_ref[...],
                    0.0)
            # No per-layer node mask: padded adjacency rows/cols are zero, so
            # padded h rows never reach real outputs; S is masked below.

            # ---- soft assignment S = softmax(A_hat @ h @ W_pool) ------------
            ah = jnp.dot(adj_bf, h.astype(jnp.bfloat16),
                         preferred_element_type=jnp.float32)
            logits = jnp.dot(ah.astype(jnp.bfloat16), wpool_ref[...],
                             preferred_element_type=jnp.float32)
            if k_pad > true_k:
                cluster_mask = lax.broadcasted_iota(
                    jnp.int32, (1, k_pad), 1) < true_k
                logits = jnp.where(cluster_mask, logits, -1e30)
            m = jnp.max(logits, axis=-1, keepdims=True)
            e = jnp.exp(logits - m)
            denom = jnp.sum(e, axis=-1, keepdims=True)
            s = e * pl.reciprocal(denom, approx=True)
            if n_pad > true_n:
                node_mask = (lax.broadcasted_iota(jnp.int32, (n_pad, 1), 0)
                             < true_n).astype(jnp.float32)
                s = s * node_mask      # padded node rows contribute nothing

            # ---- DiffPool: X' = S^T h ; A' = S^T A S (bf16 in, f32 acc) -----
            s_bf = s.astype(jnp.bfloat16)
            h_bf = h.astype(jnp.bfloat16)
            xp = lax.dot_general(s_bf, h_bf, (((0,), (0,)), ((), ())),
                                 preferred_element_type=jnp.float32)
            sa = lax.dot_general(s_bf, adj_bf, (((0,), (0,)), ((), ())),
                                 preferred_element_type=jnp.float32)
            ap = jnp.dot(sa.astype(jnp.bfloat16), s_bf,
                         preferred_element_type=jnp.float32)
            sts = lax.dot_general(s_bf, s_bf, (((0,), (0,)), ((), ())),
                                  preferred_element_type=jnp.float32)

            # ---- aux loss ----------------------------------------------------
            # link:  ||A - SS^T||_F^2 = ||A||^2 - 2*tr(S^T A S) + ||S^T S||^2
            row_i = lax.broadcasted_iota(jnp.int32, (k_pad, k_pad), 0)
            col_i = lax.broadcasted_iota(jnp.int32, (k_pad, k_pad), 1)
            trace_ap = jnp.sum(jnp.where(row_i == col_i, ap, 0.0))
            link = (a_sq - 2.0 * trace_ap + jnp.sum(sts * sts)) \
                / float(true_n * true_n)
            # entropy via logsumexp identity:
            #   -sum p log p = sum_rows(m + log Z) - sum(s * logits)
            logz = m + jnp.log(denom)
            if n_pad > true_n:
                logz = logz * node_mask
            ent = (jnp.sum(logz) - jnp.sum(s * logits)) / float(true_n)
            total_loss = total_loss + link + ent

            # ---- carry to the next block (stays resident — no HBM) ----------
            rowsum = jnp.sum(ap, axis=-1, keepdims=True)
            adj = ap / (rowsum + 1e-9)   # exact division (feeds later blocks)
            h = xp

        xout_ref[...] = h
        loss_ref[0] = total_loss

    return kernel


# ------------------------------ pallas_call wrapper ---------------------------

def _vmem():
    return pl.BlockSpec(memory_space=pltpu.MemorySpace.VMEM)


def fused_forward(adj, x, params, true_num_nodes):
    """Run the whole pooling network as ONE pallas_call.
    Returns (x_pooled_padded, pooling_loss)."""
    inputs = [adj, x]
    block_meta = []
    cur_true_n, cur_n_pad = true_num_nodes, adj.shape[0]
    for blk in params:
        for (w, b) in blk["emb"]:
            inputs += [w, b]
        inputs.append(blk["w_pool"])
        block_meta.append(dict(num_layers=len(blk["emb"]),
                               true_n=cur_true_n, n_pad=cur_n_pad,
                               true_k=blk["num_clusters"],
                               k_pad=blk["w_pool"].shape[1]))
        cur_true_n = blk["num_clusters"]
        cur_n_pad = blk["w_pool"].shape[1]

    kernel = _make_fused_kernel(block_meta)
    xout, loss = pl.pallas_call(
        kernel,
        in_specs=[_vmem() for _ in inputs],
        out_specs=(_vmem(),
                   pl.BlockSpec(memory_space=pltpu.MemorySpace.SMEM)),
        out_shape=(jax.ShapeDtypeStruct((cur_n_pad, F_PAD), jnp.float32),
                   jax.ShapeDtypeStruct((1,), jnp.float32)),
        # Working set is <1 MiB at these shapes; explicit limit keeps us well
        # inside v7x's smaller (64 MiB physical / 32 MiB scoped) VMEM.
        # TODO(synk): for graphs with >~1-2K nodes this untiled, fully
        #             VMEM-resident design must grow a row-tiled grid (and a
        #             "parallel" batch axis to use v7x's second TensorCore).
        compiler_params=pltpu.CompilerParams(vmem_limit_bytes=32 * 1024 * 1024),
    )(*inputs)
    return xout, loss[0]


# -------------------------------- plain-JAX glue -------------------------------

def _pad2(x, shape):
    pad_width = [(0, t - s) for s, t in zip(x.shape, shape)]
    return jnp.pad(x, pad_width)


def build_normalized_adj_padded(edge_index, num_nodes, n_pad, directed_graphs=False):
    a = jnp.zeros((n_pad, n_pad), jnp.float32)
    a = a.at[edge_index[0], edge_index[1]].set(1.0)
    if not directed_graphs:
        a = a.at[edge_index[1], edge_index[0]].set(1.0)
    # self loops only on real nodes; padded rows/cols stay exactly zero
    self_loops = (jnp.arange(n_pad) < num_nodes).astype(jnp.float32)
    a = a + jnp.diag(self_loops)
    deg = jnp.sum(a, axis=-1, keepdims=True)
    return a / jnp.maximum(deg, 1e-9)            # row-normalized A_hat


def init_params(key, layer_sizes, clusters):
    params = []
    for sizes, k_clusters in zip(layer_sizes, clusters):
        k_pad = _round_up(k_clusters, SUB)
        emb = []
        for i in range(len(sizes) - 1):
            key, k1, k2 = jax.random.split(key, 3)
            w = jax.random.normal(k1, (sizes[i], sizes[i + 1]), jnp.float32)
            w = w * (1.0 / jnp.sqrt(jnp.float32(sizes[i])))
            b = jax.random.normal(k2, (1, sizes[i + 1]), jnp.float32) * 0.01
            # Weights only ever feed the MXU as bf16 -> pre-cast on the host.
            emb.append((_pad2(w, (F_PAD, F_PAD)).astype(jnp.bfloat16),
                        _pad2(b, (1, F_PAD))))
        key, k3 = jax.random.split(key)
        w_pool = jax.random.normal(k3, (sizes[-1], k_clusters), jnp.float32)
        w_pool = w_pool * (1.0 / jnp.sqrt(jnp.float32(sizes[-1])))
        params.append({"emb": emb,
                       "w_pool": _pad2(w_pool, (F_PAD, k_pad)).astype(jnp.bfloat16),
                       "num_clusters": k_clusters,
                       "out_dim": sizes[-1]})
    return params


def sparse_graph_pooling_network_forward(params, x, edge_index, batch,
                                         use_probability_weights=True,
                                         directed_graphs=False,
                                         collect_info=False):
    """Mirrors SparseGraphPoolingNetwork.forward (collect_info=False path)."""
    num_nodes = x.shape[0]
    n_pad = _round_up(num_nodes, SUB)
    adj = build_normalized_adj_padded(edge_index, num_nodes, n_pad, directed_graphs)
    xp = _pad2(x.astype(jnp.float32), (n_pad, F_PAD))

    x_all, pooling_loss = fused_forward(adj, xp, params, num_nodes)

    last_k = params[-1]["num_clusters"]
    last_out_dim = params[-1]["out_dim"]
    x_out = x_all[:last_k, :last_out_dim]         # strip node / lane padding
    batch_out = jnp.zeros((last_k,), jnp.int32)
    probabilities = None  # TODO(synk): MonteCarloBlock probability weights not modeled.

    # (x, probabilities, pooling_loss, pooling_assignments, node_assignments,
    #  pooling_activations, batch, edge_indices, batches, input_embeddings, None)
    return (x_out, probabilities, pooling_loss, None, None, None, batch_out,
            None, None, None, None)


# -------------------------------------- main -----------------------------------

if __name__ == "__main__":
    key = jax.random.PRNGKey(0)
    num_nodes, num_node_features, num_edges = 16, 4, 40
    layer_sizes = [[4, 32, 32], [32, 32, 32]]   # per pool block conv layer sizes
    clusters = [8, 4]                           # pooled node count per block

    k_params, k_x, k_e = jax.random.split(key, 3)
    params = init_params(k_params, layer_sizes, clusters)
    x = jax.random.normal(k_x, (num_nodes, num_node_features), jnp.float32)
    edge_index = jax.random.randint(k_e, (2, num_edges), 0, num_nodes, jnp.int32)
    batch = jnp.zeros((num_nodes,), jnp.int32)

    out = sparse_graph_pooling_network_forward(params, x, edge_index, batch)
    x_out, probabilities, pooling_loss = out[0], out[1], out[2]
    jax.block_until_ready(x_out)
    jax.block_until_ready(pooling_loss)
    assert x_out.shape == (clusters[-1], layer_sizes[-1][-1])
    assert bool(jnp.isfinite(pooling_loss))
    print("KERNEL_OK")
</pallas_src>

<mosaic_0001>
module attributes {stable_mosaic.version = 11 : i64} {
  func.func @kernel(%arg0: memref<16x16xf32, #tpu.memory_space<vmem>>, %arg1: memref<16x128xf32, #tpu.memory_space<vmem>>, %arg2: memref<128x128xbf16, #tpu.memory_space<vmem>>, %arg3: memref<1x128xf32, #tpu.memory_space<vmem>>, %arg4: memref<128x128xbf16, #tpu.memory_space<vmem>>, %arg5: memref<1x128xf32, #tpu.memory_space<vmem>>, %arg6: memref<128x16xbf16, #tpu.memory_space<vmem>>, %arg7: memref<128x128xbf16, #tpu.memory_space<vmem>>, %arg8: memref<1x128xf32, #tpu.memory_space<vmem>>, %arg9: memref<128x128xbf16, #tpu.memory_space<vmem>>, %arg10: memref<1x128xf32, #tpu.memory_space<vmem>>, %arg11: memref<128x16xbf16, #tpu.memory_space<vmem>>, %arg12: memref<16x128xf32, #tpu.memory_space<vmem>>, %arg13: memref<1xf32, #tpu.memory_space<smem>>) attributes {dimension_semantics = [], scalar_prefetch = 0 : i64, scratch_operands = 0 : i64, tpu.core_type = #tpu.core_type<tc>} {
    %c0 = arith.constant 0 : index
    %c0_0 = arith.constant 0 : index
    %0 = vector.load %arg1[%c0, %c0_0] : memref<16x128xf32, #tpu.memory_space<vmem>>, vector<16x128xf32>
    %c0_1 = arith.constant 0 : index
    %c0_2 = arith.constant 0 : index
    %1 = vector.load %arg0[%c0_1, %c0_2] : memref<16x16xf32, #tpu.memory_space<vmem>>, vector<16x16xf32>
    %2 = arith.mulf %1, %1 : vector<16x16xf32>
    %3 = vector.shape_cast %2 : vector<16x16xf32> to vector<1x16x16xf32>
    %cst = arith.constant dense<0.000000e+00> : vector<1xf32>
    %4 = vector.multi_reduction <add>, %3, %cst [1, 2] : vector<1x16x16xf32> to vector<1xf32>
    %5 = vector.shape_cast %4 : vector<1xf32> to vector<1x1x1xf32>
    %6 = vector.extract %5[0, 0, 0] : f32 from vector<1x1x1xf32>
    %7 = arith.truncf %1 : vector<16x16xf32> to vector<16x16xbf16>
    %8 = arith.truncf %0 : vector<16x128xf32> to vector<16x128xbf16>
    %cst_3 = arith.constant dense<0.000000e+00> : vector<16x128xf32>
    %9 = tpu.matmul %7, %8, %cst_3 {dimension_numbers = #tpu.dot_dimension_numbers<[1], [0], [0], [1], [0, 0, 1, 1], [], []>} : vector<16x16xbf16>, vector<16x128xbf16>, vector<16x128xf32> -> vector<16x128xf32>
    %10 = arith.truncf %9 : vector<16x128xf32> to vector<16x128xbf16>
    %c0_4 = arith.constant 0 : index
    %c0_5 = arith.constant 0 : index
    %11 = vector.load %arg2[%c0_4, %c0_5] : memref<128x128xbf16, #tpu.memory_space<vmem>>, vector<128x128xbf16>
    %cst_6 = arith.constant dense<0.000000e+00> : vector<16x128xf32>
    %12 = tpu.matmul %10, %11, %cst_6 {dimension_numbers = #tpu.dot_dimension_numbers<[1], [0], [0], [1], [0, 0, 1, 1], [], []>} : vector<16x128xbf16>, vector<128x128xbf16>, vector<16x128xf32> -> vector<16x128xf32>
    %c0_7 = arith.constant 0 : index
    %c0_8 = arith.constant 0 : index
    %13 = vector.load %arg3[%c0_7, %c0_8] : memref<1x128xf32, #tpu.memory_space<vmem>>, vector<1x128xf32>
    %14 = vector.broadcast %13 : vector<1x128xf32> to vector<16x128xf32>
    %15 = arith.addf %12, %14 : vector<16x128xf32>
    %cst_9 = arith.constant 0.000000e+00 : f32
    %16 = vector.broadcast %cst_9 : f32 to vector<16x128xf32>
    %17 = arith.maximumf %15, %16 : vector<16x128xf32>
    %18 = arith.truncf %17 : vector<16x128xf32> to vector<16x128xbf16>
    %cst_10 = arith.constant dense<0.000000e+00> : vector<16x128xf32>
    %19 = tpu.matmul %7, %18, %cst_10 {dimension_numbers = #tpu.dot_dimension_numbers<[1], [0], [0], [1], [0, 0, 1, 1], [], []>} : vector<16x16xbf16>, vector<16x128xbf16>, vector<16x128xf32> -> vector<16x128xf32>
    %20 = arith.truncf %19 : vector<16x128xf32> to vector<16x128xbf16>
    %c0_11 = arith.constant 0 : index
    %c0_12 = arith.constant 0 : index
    %21 = vector.load %arg4[%c0_11, %c0_12] : memref<128x128xbf16, #tpu.memory_space<vmem>>, vector<128x128xbf16>
    %cst_13 = arith.constant dense<0.000000e+00> : vector<16x128xf32>
    %22 = tpu.matmul %20, %21, %cst_13 {dimension_numbers = #tpu.dot_dimension_numbers<[1], [0], [0], [1], [0, 0, 1, 1], [], []>} : vector<16x128xbf16>, vector<128x128xbf16>, vector<16x128xf32> -> vector<16x128xf32>
    %c0_14 = arith.constant 0 : index
    %c0_15 = arith.constant 0 : index
    %23 = vector.load %arg5[%c0_14, %c0_15] : memref<1x128xf32, #tpu.memory_space<vmem>>, vector<1x128xf32>
    %24 = vector.broadcast %23 : vector<1x128xf32> to vector<16x128xf32>
    %25 = arith.addf %22, %24 : vector<16x128xf32>
    %cst_16 = arith.constant 0.000000e+00 : f32
    %26 = vector.broadcast %cst_16 : f32 to vector<16x128xf32>
    %27 = arith.maximumf %25, %26 : vector<16x128xf32>
    %28 = arith.truncf %27 : vector<16x128xf32> to vector<16x128xbf16>
    %cst_17 = arith.constant dense<0.000000e+00> : vector<16x128xf32>
    %29 = tpu.matmul %7, %28, %cst_17 {dimension_numbers = #tpu.dot_dimension_numbers<[1], [0], [0], [1], [0, 0, 1, 1], [], []>} : vector<16x16xbf16>, vector<16x128xbf16>, vector<16x128xf32> -> vector<16x128xf32>
    %30 = arith.truncf %29 : vector<16x128xf32> to vector<16x128xbf16>
    %c0_18 = arith.constant 0 : index
    %c0_19 = arith.constant 0 : index
    %31 = vector.load %arg6[%c0_18, %c0_19] : memref<128x16xbf16, #tpu.memory_space<vmem>>, vector<128x16xbf16>
    %cst_20 = arith.constant dense<0.000000e+00> : vector<16x16xf32>
    %32 = tpu.matmul %30, %31, %cst_20 {dimension_numbers = #tpu.dot_dimension_numbers<[1], [0], [0], [1], [0, 0, 1, 1], [], []>} : vector<16x128xbf16>, vector<128x16xbf16>, vector<16x16xf32> -> vector<16x16xf32>
    %33 = tpu.iota {dimensions = array<i32: 1>} : vector<1x16xi32>
    %c8_i32 = arith.constant 8 : i32
    %34 = vector.broadcast %c8_i32 : i32 to vector<1x16xi32>
    %35 = arith.cmpi slt, %33, %34 : vector<1x16xi32>
    %cst_21 = arith.constant -1.000000e+30 : f32
    %36 = vector.shape_cast %35 : vector<1x16xi1> to vector<1x16xi1>
    %37 = vector.broadcast %36 : vector<1x16xi1> to vector<16x16xi1>
    %38 = vector.broadcast %cst_21 : f32 to vector<16x16xf32>
    %39 = arith.select %37, %32, %38 : vector<16x16xi1>, vector<16x16xf32>
    %cst_22 = arith.constant dense<0xFF800000> : vector<16xf32>
    %40 = vector.multi_reduction <maximumf>, %39, %cst_22 [1] : vector<16x16xf32> to vector<16xf32>
    %41 = vector.shape_cast %40 : vector<16xf32> to vector<16x1xf32>
    %42 = vector.broadcast %41 : vector<16x1xf32> to vector<16x16xf32>
    %43 = arith.subf %39, %42 : vector<16x16xf32>
    %44 = math.exp %43 : vector<16x16xf32>
    %cst_23 = arith.constant dense<0.000000e+00> : vector<16xf32>
    %45 = vector.multi_reduction <add>, %44, %cst_23 [1] : vector<16x16xf32> to vector<16xf32>
    %46 = vector.shape_cast %45 : vector<16xf32> to vector<16x1xf32>
    %47 = tpu.reciprocal %46 {approx = true} : vector<16x1xf32> -> vector<16x1xf32>
    %48 = vector.broadcast %47 : vector<16x1xf32> to vector<16x16xf32>
    %49 = arith.mulf %44, %48 : vector<16x16xf32>
    %50 = arith.truncf %49 : vector<16x16xf32> to vector<16x16xbf16>
    %51 = arith.truncf %27 : vector<16x128xf32> to vector<16x128xbf16>
    %cst_24 = arith.constant dense<0.000000e+00> : vector<16x128xf32>
    %52 = tpu.matmul %50, %51, %cst_24 {dimension_numbers = #tpu.dot_dimension_numbers<[0], [0], [1], [1], [0, 1, 1, 1], [], []>} : vector<16x16xbf16>, vector<16x128xbf16>, vector<16x128xf32> -> vector<16x128xf32>
    %cst_25 = arith.constant dense<0.000000e+00> : vector<16x16xf32>
    %53 = tpu.matmul %50, %7, %cst_25 {dimension_numbers = #tpu.dot_dimension_numbers<[0], [0], [1], [1], [0, 1, 1, 1], [], []>} : vector<16x16xbf16>, vector<16x16xbf16>, vector<16x16xf32> -> vector<16x16xf32>
    %54 = arith.truncf %53 : vector<16x16xf32> to vector<16x16xbf16>
    %cst_26 = arith.constant dense<0.000000e+00> : vector<16x16xf32>
    %55 = tpu.matmul %54, %50, %cst_26 {dimension_numbers = #tpu.dot_dimension_numbers<[1], [0], [0], [1], [0, 0, 1, 1], [], []>} : vector<16x16xbf16>, vector<16x16xbf16>, vector<16x16xf32> -> vector<16x16xf32>
    %cst_27 = arith.constant dense<0.000000e+00> : vector<16x16xf32>
    %56 = tpu.matmul %50, %50, %cst_27 {dimension_numbers = #tpu.dot_dimension_numbers<[0], [0], [1], [1], [0, 1, 1, 1], [], []>} : vector<16x16xbf16>, vector<16x16xbf16>, vector<16x16xf32> -> vector<16x16xf32>
    %57 = tpu.iota {dimensions = array<i32: 0>} : vector<16x16xi32>
    %58 = tpu.iota {dimensions = array<i32: 1>} : vector<16x16xi32>
    %59 = arith.cmpi eq, %57, %58 : vector<16x16xi32>
    %cst_28 = arith.constant 0.000000e+00 : f32
    %60 = vector.broadcast %cst_28 : f32 to vector<16x16xf32>
    %61 = arith.select %59, %55, %60 : vector<16x16xi1>, vector<16x16xf32>
    %62 = vector.shape_cast %61 : vector<16x16xf32> to vector<1x16x16xf32>
    %cst_29 = arith.constant dense<0.000000e+00> : vector<1xf32>
    %63 = vector.multi_reduction <add>, %62, %cst_29 [1, 2] : vector<1x16x16xf32> to vector<1xf32>
    %64 = vector.shape_cast %63 : vector<1xf32> to vector<1x1x1xf32>
    %65 = vector.extract %64[0, 0, 0] : f32 from vector<1x1x1xf32>
    %cst_30 = arith.constant 2.000000e+00 : f32
    %66 = arith.mulf %cst_30, %65 : f32
    %67 = arith.subf %6, %66 : f32
    %68 = arith.mulf %56, %56 : vector<16x16xf32>
    %69 = vector.shape_cast %68 : vector<16x16xf32> to vector<1x16x16xf32>
    %cst_31 = arith.constant dense<0.000000e+00> : vector<1xf32>
    %70 = vector.multi_reduction <add>, %69, %cst_31 [1, 2] : vector<1x16x16xf32> to vector<1xf32>
    %71 = vector.shape_cast %70 : vector<1xf32> to vector<1x1x1xf32>
    %72 = vector.extract %71[0, 0, 0] : f32 from vector<1x1x1xf32>
    %73 = arith.addf %67, %72 : f32
    %cst_32 = arith.constant 2.560000e+02 : f32
    %74 = arith.divf %73, %cst_32 : f32
    %75 = math.log %46 : vector<16x1xf32>
    %76 = arith.addf %41, %75 : vector<16x1xf32>
    %77 = vector.shape_cast %76 : vector<16x1xf32> to vector<1x16x1xf32>
    %cst_33 = arith.constant dense<0.000000e+00> : vector<1xf32>
    %78 = vector.multi_reduction <add>, %77, %cst_33 [1, 2] : vector<1x16x1xf32> to vector<1xf32>
    %79 = vector.shape_cast %78 : vector<1xf32> to vector<1x1x1xf32>
    %80 = vector.extract %79[0, 0, 0] : f32 from vector<1x1x1xf32>
    %81 = arith.mulf %49, %39 : vector<16x16xf32>
    %82 = vector.shape_cast %81 : vector<16x16xf32> to vector<1x16x16xf32>
    %cst_34 = arith.constant dense<0.000000e+00> : vector<1xf32>
    %83 = vector.multi_reduction <add>, %82, %cst_34 [1, 2] : vector<1x16x16xf32> to vector<1xf32>
    %84 = vector.shape_cast %83 : vector<1xf32> to vector<1x1x1xf32>
    %85 = vector.extract %84[0, 0, 0] : f32 from vector<1x1x1xf32>
    %86 = arith.subf %80, %85 : f32
    %cst_35 = arith.constant 1.600000e+01 : f32
    %87 = arith.divf %86, %cst_35 : f32
    %cst_36 = arith.constant 0.000000e+00 : f32
    %88 = arith.addf %cst_36, %74 : f32
    %89 = arith.addf %88, %87 : f32
    %cst_37 = arith.constant dense<0.000000e+00> : vector<16xf32>
    %90 = vector.multi_reduction <add>, %55, %cst_37 [1] : vector<16x16xf32> to vector<16xf32>
    %91 = vector.shape_cast %90 : vector<16xf32> to vector<16x1xf32>
    %cst_38 = arith.constant 9.99999971E-10 : f32
    %92 = vector.broadcast %cst_38 : f32 to vector<16x1xf32>
    %93 = arith.addf %91, %92 : vector<16x1xf32>
    %94 = vector.broadcast %93 : vector<16x1xf32> to vector<16x16xf32>
    %95 = arith.divf %55, %94 : vector<16x16xf32>
    %96 = arith.mulf %95, %95 : vector<16x16xf32>
    %97 = vector.shape_cast %96 : vector<16x16xf32> to vector<1x16x16xf32>
    %cst_39 = arith.constant dense<0.000000e+00> : vector<1xf32>
    %98 = vector.multi_reduction <add>, %97, %cst_39 [1, 2] : vector<1x16x16xf32> to vector<1xf32>
    %99 = vector.shape_cast %98 : vector<1xf32> to vector<1x1x1xf32>
    %100 = vector.extract %99[0, 0, 0] : f32 from vector<1x1x1xf32>
    %101 = arith.truncf %95 : vector<16x16xf32> to vector<16x16xbf16>
    %102 = arith.truncf %52 : vector<16x128xf32> to vector<16x128xbf16>
    %cst_40 = arith.constant dense<0.000000e+00> : vector<16x128xf32>
    %103 = tpu.matmul %101, %102, %cst_40 {dimension_numbers = #tpu.dot_dimension_numbers<[1], [0], [0], [1], [0, 0, 1, 1], [], []>} : vector<16x16xbf16>, vector<16x128xbf16>, vector<16x128xf32> -> vector<16x128xf32>
    %104 = arith.truncf %103 : vector<16x128xf32> to vector<16x128xbf16>
    %c0_41 = arith.constant 0 : index
    %c0_42 = arith.constant 0 : index
    %105 = vector.load %arg7[%c0_41, %c0_42] : memref<128x128xbf16, #tpu.memory_space<vmem>>, vector<128x128xbf16>
    %cst_43 = arith.constant dense<0.000000e+00> : vector<16x128xf32>
    %106 = tpu.matmul %104, %105, %cst_43 {dimension_numbers = #tpu.dot_dimension_numbers<[1], [0], [0], [1], [0, 0, 1, 1], [], []>} : vector<16x128xbf16>, vector<128x128xbf16>, vector<16x128xf32> -> vector<16x128xf32>
    %c0_44 = arith.constant 0 : index
    %c0_45 = arith.constant 0 : index
    %107 = vector.load %arg8[%c0_44, %c0_45] : memref<1x128xf32, #tpu.memory_space<vmem>>, vector<1x128xf32>
    %108 = vector.broadcast %107 : vector<1x128xf32> to vector<16x128xf32>
    %109 = arith.addf %106, %108 : vector<16x128xf32>
    %cst_46 = arith.constant 0.000000e+00 : f32
    %110 = vector.broadcast %cst_46 : f32 to vector<16x128xf32>
    %111 = arith.maximumf %109, %110 : vector<16x128xf32>
    %112 = arith.truncf %111 : vector<16x128xf32> to vector<16x128xbf16>
    %cst_47 = arith.constant dense<0.000000e+00> : vector<16x128xf32>
    %113 = tpu.matmul %101, %112, %cst_47 {dimension_numbers = #tpu.dot_dimension_numbers<[1], [0], [0], [1], [0, 0, 1, 1], [], []>} : vector<16x16xbf16>, vector<16x128xbf16>, vector<16x128xf32> -> vector<16x128xf32>
    %114 = arith.truncf %113 : vector<16x128xf32> to vector<16x128xbf16>
    %c0_48 = arith.constant 0 : index
    %c0_49 = arith.constant 0 : index
    %115 = vector.load %arg9[%c0_48, %c0_49] : memref<128x128xbf16, #tpu.memory_space<vmem>>, vector<128x128xbf16>
    %cst_50 = arith.constant dense<0.000000e+00> : vector<16x128xf32>
    %116 = tpu.matmul %114, %115, %cst_50 {dimension_numbers = #tpu.dot_dimension_numbers<[1], [0], [0], [1], [0, 0, 1, 1], [], []>} : vector<16x128xbf16>, vector<128x128xbf16>, vector<16x128xf32> -> vector<16x128xf32>
    %c0_51 = arith.constant 0 : index
    %c0_52 = arith.constant 0 : index
    %117 = vector.load %arg10[%c0_51, %c0_52] : memref<1x128xf32, #tpu.memory_space<vmem>>, vector<1x128xf32>
    %118 = vector.broadcast %117 : vector<1x128xf32> to vector<16x128xf32>
    %119 = arith.addf %116, %118 : vector<16x128xf32>
    %cst_53 = arith.constant 0.000000e+00 : f32
    %120 = vector.broadcast %cst_53 : f32 to vector<16x128xf32>
    %121 = arith.maximumf %119, %120 : vector<16x128xf32>
    %122 = arith.truncf %121 : vector<16x128xf32> to vector<16x128xbf16>
    %cst_54 = arith.constant dense<0.000000e+00> : vector<16x128xf32>
    %123 = tpu.matmul %101, %122, %cst_54 {dimension_numbers = #tpu.dot_dimension_numbers<[1], [0], [0], [1], [0, 0, 1, 1], [], []>} : vector<16x16xbf16>, vector<16x128xbf16>, vector<16x128xf32> -> vector<16x128xf32>
    %124 = arith.truncf %123 : vector<16x128xf32> to vector<16x128xbf16>
    %c0_55 = arith.constant 0 : index
    %c0_56 = arith.constant 0 : index
    %125 = vector.load %arg11[%c0_55, %c0_56] : memref<128x16xbf16, #tpu.memory_space<vmem>>, vector<128x16xbf16>
    %cst_57 = arith.constant dense<0.000000e+00> : vector<16x16xf32>
    %126 = tpu.matmul %124, %125, %cst_57 {dimension_numbers = #tpu.dot_dimension_numbers<[1], [0], [0], [1], [0, 0, 1, 1], [], []>} : vector<16x128xbf16>, vector<128x16xbf16>, vector<16x16xf32> -> vector<16x16xf32>
    %127 = tpu.iota {dimensions = array<i32: 1>} : vector<1x16xi32>
    %c4_i32 = arith.constant 4 : i32
    %128 = vector.broadcast %c4_i32 : i32 to vector<1x16xi32>
    %129 = arith.cmpi slt, %127, %128 : vector<1x16xi32>
    %cst_58 = arith.constant -1.000000e+30 : f32
    %130 = vector.shape_cast %129 : vector<1x16xi1> to vector<1x16xi1>
    %131 = vector.broadcast %130 : vector<1x16xi1> to vector<16x16xi1>
    %132 = vector.broadcast %cst_58 : f32 to vector<16x16xf32>
    %133 = arith.select %131, %126, %132 : vector<16x16xi1>, vector<16x16xf32>
    %cst_59 = arith.constant dense<0xFF800000> : vector<16xf32>
    %134 = vector.multi_reduction <maximumf>, %133, %cst_59 [1] : vector<16x16xf32> to vector<16xf32>
    %135 = vector.shape_cast %134 : vector<16xf32> to vector<16x1xf32>
    %136 = vector.broadcast %135 : vector<16x1xf32> to vector<16x16xf32>
    %137 = arith.subf %133, %136 : vector<16x16xf32>
    %138 = math.exp %137 : vector<16x16xf32>
    %cst_60 = arith.constant dense<0.000000e+00> : vector<16xf32>
    %139 = vector.multi_reduction <add>, %138, %cst_60 [1] : vector<16x16xf32> to vector<16xf32>
    %140 = vector.shape_cast %139 : vector<16xf32> to vector<16x1xf32>
    %141 = tpu.reciprocal %140 {approx = true} : vector<16x1xf32> -> vector<16x1xf32>
    %142 = vector.broadcast %141 : vector<16x1xf32> to vector<16x16xf32>
    %143 = arith.mulf %138, %142 : vector<16x16xf32>
    %144 = tpu.iota {dimensions = array<i32: 0>} : vector<16x1xi32>
    %c8_i32_61 = arith.constant 8 : i32
    %145 = vector.broadcast %c8_i32_61 : i32 to vector<16x1xi32>
    %146 = arith.cmpi slt, %144, %145 : vector<16x1xi32>
    %147 = arith.extui %146 : vector<16x1xi1> to vector<16x1xi32>
    %148 = arith.sitofp %147 : vector<16x1xi32> to vector<16x1xf32>
    %149 = vector.broadcast %148 : vector<16x1xf32> to vector<16x16xf32>
    %150 = arith.mulf %143, %149 : vector<16x16xf32>
    %151 = arith.truncf %150 : vector<16x16xf32> to vector<16x16xbf16>
    %152 = arith.truncf %121 : vector<16x128xf32> to vector<16x128xbf16>
    %cst_62 = arith.constant dense<0.000000e+00> : vector<16x128xf32>
    %153 = tpu.matmul %151, %152, %cst_62 {dimension_numbers = #tpu.dot_dimension_numbers<[0], [0], [1], [1], [0, 1, 1, 1], [], []>} : vector<16x16xbf16>, vector<16x128xbf16>, vector<16x128xf32> -> vector<16x128xf32>
    %cst_63 = arith.constant dense<0.000000e+00> : vector<16x16xf32>
    %154 = tpu.matmul %151, %101, %cst_63 {dimension_numbers = #tpu.dot_dimension_numbers<[0], [0], [1], [1], [0, 1, 1, 1], [], []>} : vector<16x16xbf16>, vector<16x16xbf16>, vector<16x16xf32> -> vector<16x16xf32>
    %155 = arith.truncf %154 : vector<16x16xf32> to vector<16x16xbf16>
    %cst_64 = arith.constant dense<0.000000e+00> : vector<16x16xf32>
    %156 = tpu.matmul %155, %151, %cst_64 {dimension_numbers = #tpu.dot_dimension_numbers<[1], [0], [0], [1], [0, 0, 1, 1], [], []>} : vector<16x16xbf16>, vector<16x16xbf16>, vector<16x16xf32> -> vector<16x16xf32>
    %cst_65 = arith.constant dense<0.000000e+00> : vector<16x16xf32>
    %157 = tpu.matmul %151, %151, %cst_65 {dimension_numbers = #tpu.dot_dimension_numbers<[0], [0], [1], [1], [0, 1, 1, 1], [], []>} : vector<16x16xbf16>, vector<16x16xbf16>, vector<16x16xf32> -> vector<16x16xf32>
    %158 = tpu.iota {dimensions = array<i32: 0>} : vector<16x16xi32>
    %159 = tpu.iota {dimensions = array<i32: 1>} : vector<16x16xi32>
    %160 = arith.cmpi eq, %158, %159 : vector<16x16xi32>
    %cst_66 = arith.constant 0.000000e+00 : f32
    %161 = vector.broadcast %cst_66 : f32 to vector<16x16xf32>
    %162 = arith.select %160, %156, %161 : vector<16x16xi1>, vector<16x16xf32>
    %163 = vector.shape_cast %162 : vector<16x16xf32> to vector<1x16x16xf32>
    %cst_67 = arith.constant dense<0.000000e+00> : vector<1xf32>
    %164 = vector.multi_reduction <add>, %163, %cst_67 [1, 2] : vector<1x16x16xf32> to vector<1xf32>
    %165 = vector.shape_cast %164 : vector<1xf32> to vector<1x1x1xf32>
    %166 = vector.extract %165[0, 0, 0] : f32 from vector<1x1x1xf32>
    %cst_68 = arith.constant 2.000000e+00 : f32
    %167 = arith.mulf %cst_68, %166 : f32
    %168 = arith.subf %100, %167 : f32
    %169 = arith.mulf %157, %157 : vector<16x16xf32>
    %170 = vector.shape_cast %169 : vector<16x16xf32> to vector<1x16x16xf32>
    %cst_69 = arith.constant dense<0.000000e+00> : vector<1xf32>
    %171 = vector.multi_reduction <add>, %170, %cst_69 [1, 2] : vector<1x16x16xf32> to vector<1xf32>
    %172 = vector.shape_cast %171 : vector<1xf32> to vector<1x1x1xf32>
    %173 = vector.extract %172[0, 0, 0] : f32 from vector<1x1x1xf32>
    %174 = arith.addf %168, %173 : f32
    %cst_70 = arith.constant 6.400000e+01 : f32
    %175 = arith.divf %174, %cst_70 : f32
    %176 = math.log %140 : vector<16x1xf32>
    %177 = arith.addf %135, %176 : vector<16x1xf32>
    %178 = arith.mulf %177, %148 : vector<16x1xf32>
    %179 = vector.shape_cast %178 : vector<16x1xf32> to vector<1x16x1xf32>
    %cst_71 = arith.constant dense<0.000000e+00> : vector<1xf32>
    %180 = vector.multi_reduction <add>, %179, %cst_71 [1, 2] : vector<1x16x1xf32> to vector<1xf32>
    %181 = vector.shape_cast %180 : vector<1xf32> to vector<1x1x1xf32>
    %182 = vector.extract %181[0, 0, 0] : f32 from vector<1x1x1xf32>
    %183 = arith.mulf %150, %133 : vector<16x16xf32>
    %184 = vector.shape_cast %183 : vector<16x16xf32> to vector<1x16x16xf32>
    %cst_72 = arith.constant dense<0.000000e+00> : vector<1xf32>
    %185 = vector.multi_reduction <add>, %184, %cst_72 [1, 2] : vector<1x16x16xf32> to vector<1xf32>
    %186 = vector.shape_cast %185 : vector<1xf32> to vector<1x1x1xf32>
    %187 = vector.extract %186[0, 0, 0] : f32 from vector<1x1x1xf32>
    %188 = arith.subf %182, %187 : f32
    %cst_73 = arith.constant 8.000000e+00 : f32
    %189 = arith.divf %188, %cst_73 : f32
    %190 = arith.addf %89, %175 : f32
    %191 = arith.addf %190, %189 : f32
    %c0_74 = arith.constant 0 : index
    %c0_75 = arith.constant 0 : index
    %192 = vector.load %arg12[%c0_74, %c0_75] : memref<16x128xf32, #tpu.memory_space<vmem>>, vector<16x128xf32>
    tpu.vector_store %arg12[%c0_74, %c0_75], %153 {strides = array<i32>} : memref<16x128xf32, #tpu.memory_space<vmem>>, vector<16x128xf32>,
    %c0_76 = arith.constant 0 : index
    %193 = memref.load %arg13[%c0_76] : memref<1xf32, #tpu.memory_space<smem>>
    memref.store %191, %arg13[%c0_76] : memref<1xf32, #tpu.memory_space<smem>>
    return
  }
}

</mosaic_0001>

<bundles_post_ra>
// kernel: tpu_custom_call.1
= control target key start
LH: loop header
LB: loop body
LE: loop exit
PB: predicated region body
PF: predicated region fallthrough
CT: control target
= control target key end

     0   :  { %19 = vsyncpa [#allocation3], 0  ;;  %s2068_s0 = inlined_call_operand.hbm [shape: f32[16,16], index: 0, kind: input, shape index: {}]   ;;  %s2069_s1 = inlined_call_operand.hbm [shape: f32[16,128], index: 1, kind: input, shape index: {}]   ;;  %s2070_s2 = inlined_call_operand.vmem [shape: bf16[128,128], index: 2, kind: input, shape index: {}]   ;;  %s2071_s3 = inlined_call_operand.vmem [shape: f32[1,128], index: 3, kind: input, shape index: {}]   ;;  %s2072_s4 = inlined_call_operand.vmem [shape: bf16[128,128], index: 4, kind: input, shape index: {}]   ;;  %s2073_s5 = inlined_call_operand.vmem [shape: f32[1,128], index: 5, kind: input, shape index: {}]   ;;  %s2074_s6 = inlined_call_operand.vmem [shape: bf16[128,16], index: 6, kind: input, shape index: {}]   ;;  %s2075_s7 = inlined_call_operand.hbm [shape: bf16[128,128], index: 7, kind: input, shape index: {}]   ;;  %s2076_s8 = inlined_call_operand.vmem [shape: f32[1,128], index: 8, kind: input, shape index: {}]   ;;  %s2077_s9 = inlined_call_operand.hbm [shape: bf16[128,128], index: 9, kind: input, shape index: {}]   ;;  %s2078_s10 = inlined_call_operand.vmem [shape: f32[1,128], index: 10, kind: input, shape index: {}]   ;;  %s2079_s11 = inlined_call_operand.vmem [shape: bf16[128,16], index: 11, kind: input, shape index: {}]   ;;  %s2080_s12 = inlined_call_operand.hbm [shape: f32[16,128], index: 12, kind: output, shape index: {0}]   ;;  %s2081_s13 = inlined_call_operand.hbm [shape: f32[1], index: 13, kind: output, shape index: {1}]  }
   0x1   :  { %20 = vsyncpa [#allocation7], 0 }
   0x2   :  { %21 = vsyncpa [#allocation10], 0 }
   0x3   :  { %22 = vsyncpa [#allocation4], 0 }
   0x4   :  { %23 = vsyncpa [#allocation5], 0  ;;  %s41_s27 = sshll.u32 %s2069_s1, 4  ;;  %s1695_s28 = smov [#allocation6]   ;;  %s42_s27 = int_to_ptr.hbm [resolvable:$true] %s41_s27 }
   0x5   :  { %s43_s29 = sshll.u32 %s1695_s28, 4  ;;  %s28_s15 = sshll.u32 %s2068_s0, 4  ;;  %s44_s29 = int_to_ptr.vmem [resolvable:$true] %s43_s29  ;;  %s29_s15 = int_to_ptr.hbm [resolvable:$true] %s28_s15 }
   0x6   :  { %s1696_s16 = smov 128   ;;  %s1697_s17 = smov 8  }
   0x7   :  { %49 = dma.hbm_to_vmem [thread:$0]  %s42_s27, 256, %s44_s29, [#allocation7], %s1696_s16, %s1696_s16, %s1697_s17  }
   0x8   :  { %s1698_s18 = smov [#allocation2]   ;;  %s64_s1 = sshll.u32 %s2075_s7, 4  ;;  %s65_s1 = int_to_ptr.hbm [resolvable:$true] %s64_s1 }
   0x9   :  { %s30_s19 = sshll.u32 %s1698_s18, 4  ;;  %s1699_s0 = smov [#allocation8]   ;;  %s31_s19 = int_to_ptr.vmem [resolvable:$true] %s30_s19 }
   0xa   :  { %36 = dma.hbm_to_vmem [thread:$0]  %s29_s15, 256, %s31_s19, [#allocation3], %s1696_s16, %s1696_s16, %s1697_s17  }
   0xb   :  { %s66_s22 = sshll.u32 %s1699_s0, 4  ;;  %s79_s25 = sshll.u32 %s2077_s9, 4  ;;  %s67_s22 = int_to_ptr.vmem [resolvable:$true] %s66_s22  ;;  %s80_s25 = int_to_ptr.hbm [resolvable:$true] %s79_s25 }
   0xc   :  { %s1700_s26 = smov 64   ;;  %s1701_s27 = smov 4  }
   0xd   :  { %72 = dma.hbm_to_vmem [thread:$0]  %s65_s1, 1024, %s67_s22, [#allocation7], %s1700_s26, %s1700_s26, %s1701_s27  }
   0xe   :  { %s1702_s28 = smov [#allocation9]  }
   0xf   :  { %s81_s29 = sshll.u32 %s1702_s28, 4  ;;  %s82_s29 = int_to_ptr.vmem [resolvable:$true] %s81_s29 }
  0x10   :  { %87 = dma.hbm_to_vmem [thread:$0]  %s80_s25, 1024, %s82_s29, [#allocation10], %s1700_s26, %s1700_s26, %s1701_s27  }
  0x11   :  { %1685 = dma.done.wait [#allocation3], 256  }
  0x12   :  { %1686 = vsyncadd [#allocation3], 4294967040 }
  0x13   :  { %1687 = dma.done.wait [#allocation7], 1280  }
  0x14   :  { %1688 = vsyncadd [#allocation7], 4294966016 }
  0x15   :  { %1689 = dma.done.wait [#allocation10], 1024  }
  0x16   :  { %1690 = vsyncadd [#allocation10], 4294966272  ;;  %v109_v0 = vld [vmem:[#allocation6] sm:$0xff]  ;;  %v110_v1 = vld [vmem:[#allocation6 + $0x8] sm:$0xff]  ;;  %vm115_vm0 = vcmask 130048   ;;  %v426_v55 = vlaneseq  ;;  %vm586_vm13 = vcmask 7168  }
  0x17   :  { %v1797_v2 = vld [vmem:[#allocation2] sm:$0xff]  ;;  %v129_v3 = vpack.c.bf16 %v110_v1, %v109_v0  ;;  %v1799_v4 = vld [vmem:[#allocation2 + $0x8] sm:$0xff]  ;;  %v1429_v5 = vld [vmem:[%s2070_s2 + $0x38] sm:$0xff]  ;;  %s1186_s18 = sshll.u32 %s2080_s12, 4  ;;  %s1705_s19 = smov [#allocation11]   ;;  %s1187_s18 = int_to_ptr.hbm [resolvable:$true] %s1186_s18 }
  0x18   :  { %v1806_v6 = vpack.c.bf16 %v1799_v4, %v1797_v2  ;;  %v1428_v7 = vld [vmem:[%s2070_s2 + $0x30] sm:$0xff]  ;;  %216 = vmatpush.bf16.msra.mxu1 %v1429_v5  ;;  %v1427_v8 = vld [vmem:[%s2070_s2 + $0x28] sm:$0xff]  ;;  %v1426_v9 = vld [vmem:[%s2070_s2 + $0x20] sm:$0xff]  ;;  %v1891_v56 = vand.u32 127, %v426_v55  ;;  %s1184_s20 = sshll.u32 %s1705_s19, 4  ;;  %s1198_s19 = sshll.u32 %s2081_s13, 4  ;;  %s1185_s20 = int_to_ptr.vmem [resolvable:$true] %s1184_s20  ;;  %s1199_s19 = int_to_ptr.hbm [resolvable:$true] %s1198_s19 }
  0x19   :  { %140 = vmatpush.bf16.msra.mxu0 %v129_v3  ;;  %v1425_v10 = vld [vmem:[%s2070_s2 + $0x18] sm:$0xff]  ;;  %v1424_v11 = vld [vmem:[%s2070_s2 + $0x10] sm:$0xff]  ;;  %v1423_v12 = vld [vmem:[%s2070_s2 + $0x8] sm:$0xff] }
  0x1a   :  { %v1422_v13 = vld [vmem:[%s2070_s2] sm:$0xff]  ;;  %v1437_v17 = vld [vmem:[%s2072_s4 + $0x38] sm:$0xff]  ;;  %v1436_v18 = vld [vmem:[%s2072_s4 + $0x30] sm:$0xff]  ;;  %vm428_vm1 = vcmp.lt.s32.totalorder %v1891_v56, 8  ;;  %vm975_vm10 = vcmp.lt.s32.totalorder %v1891_v56, 4 }
  0x1b   :  { %316 = vmatpush.bf16.msra.mxu3 %v1437_v17  ;;  %v1435_v19 = vld [vmem:[%s2072_s4 + $0x28] sm:$0xff]  ;;  %v1434_v20 = vld [vmem:[%s2072_s4 + $0x20] sm:$0xff]  ;;  %v1433_v22 = vld [vmem:[%s2072_s4 + $0x18] sm:$0xff] }
  0x1c   :  { %1216 = vmatmul.msk.bf16.vlgmr.msra.gmra.mxu0 %vm115_vm0, %v1806_v6  ;;  %217 = vmatpush.bf16.msra.mxu1 %v1428_v7  ;;  %v1513_v23 = vld [vmem:[%s2071_s3] ss:$0 sm:$0xff]  ;;  %v1432_v30 = vld [vmem:[%s2072_s4 + $0x10] sm:$0xff]  ;;  %v1431_v31 = vld [vmem:[%s2072_s4 + $0x8] sm:$0xff] }
  0x1d   :  { %v1430_v32 = vld [vmem:[%s2072_s4] sm:$0xff]  ;;  %v1445_v36 = vld [vmem:[%s2074_s6 + $0x38] sm:$0xff]  ;;  %v1444_v37 = vld [vmem:[%s2074_s6 + $0x30] sm:$0xff] }
  0x1e   :  { %v1443_v38 = vld [vmem:[%s2074_s6 + $0x28] sm:$0xff]  ;;  %v1442_v39 = vld [vmem:[%s2074_s6 + $0x20] sm:$0xff]  ;;  %v1441_v41 = vld [vmem:[%s2074_s6 + $0x18] sm:$0xff] }
  0x1f   :  { %317 = vmatpush.bf16.msra.mxu3 %v1436_v18  ;;  %v1514_v42 = vld [vmem:[%s2073_s5] ss:$0 sm:$0xff]  ;;  %v1440_v49 = vld [vmem:[%s2074_s6 + $0x10] sm:$0xff]  ;;  %v1439_v50 = vld [vmem:[%s2074_s6 + $0x8] sm:$0xff] }
  0x20   :  { %218 = vmatpush.bf16.msra.mxu1 %v1427_v8  ;;  %v1438_v51 = vld [vmem:[%s2074_s6] sm:$0xff] }
  0x23   :  { %318 = vmatpush.bf16.msra.mxu3 %v1435_v19 }
  0x24   :  { %219 = vmatpush.bf16.msra.mxu1 %v1426_v9 }
  0x27   :  { %319 = vmatpush.bf16.msra.mxu3 %v1434_v20 }
  0x28   :  { %220 = vmatpush.bf16.msra.mxu1 %v1425_v10 }
  0x2b   :  { %320 = vmatpush.bf16.msra.mxu3 %v1433_v22 }
  0x2c   :  { %221 = vmatpush.bf16.msra.mxu1 %v1424_v11 }
  0x2f   :  { %321 = vmatpush.bf16.msra.mxu3 %v1432_v30 }
  0x30   :  { %222 = vmatpush.bf16.msra.mxu1 %v1423_v12 }
  0x33   :  { %322 = vmatpush.bf16.msra.mxu3 %v1431_v31 }
  0x34   :  { %223 = vmatpush.bf16.msra.mxu1 %v1422_v13 }
  0x37   :  { %323 = vmatpush.bf16.msra.mxu3 %v1430_v32 }
  0x38   :  { %496 = vmatpush.bf16.msrb.mxu1 %v1806_v6 }
  0x99   :  { %v142_v14 = vpop.f32.mrf.mxu0 }
  0xa1   :  { %v144_v15 = vpop.f32.mrf.mxu0 }
  0xa2   :  { %v147_v16 = vpack.c.bf16 %v144_v15, %v142_v14 }
  0xa4   :  { %224 = vmatmul.bf16.vlgmr.msra.gmra.mxu1 %v147_v16 }
 0x121   :  { %v225_v21 = vpop.f32.mrf.mxu1 }
 0x122   :  { %v226_v24 = vadd.f32 %v1513_v23, %v225_v21 }
 0x124   :  { %v230_v27 = vmax.f32 %v226_v24, 0.0 }
 0x129   :  { %v227_v25 = vpop.f32.mrf.mxu1 }
 0x12a   :  { %v228_v26 = vadd.f32 %v1513_v23, %v227_v25 }
 0x12c   :  { %v231_v28 = vmax.f32 %v228_v26, 0.0 }
 0x12e   :  { %v232_v29 = vpack.c.bf16 %v231_v28, %v230_v27 }
 0x130   :  { %240 = vmatpush.bf16.msra.mxu2 %v232_v29 }
 0x133   :  { %1249 = vmatmul.msk.bf16.vlgmr.msra.gmra.mxu2 %vm115_vm0, %v1806_v6 }
 0x134   :  { %412 = vmatpush.bf16.msrb.mxu2 %v1445_v36  ;;  %v1451_v36 = vld [vmem:[#allocation8 + $0x28] sm:$0xff] }
 0x138   :  { %413 = vmatpush.bf16.msrb.mxu2 %v1444_v37  ;;  %v1450_v37 = vld [vmem:[#allocation8 + $0x20] sm:$0xff] }
 0x13c   :  { %414 = vmatpush.bf16.msrb.mxu2 %v1443_v38  ;;  %v1449_v38 = vld [vmem:[#allocation8 + $0x18] sm:$0xff] }
 0x140   :  { %415 = vmatpush.bf16.msrb.mxu2 %v1442_v39  ;;  %v1448_v39 = vld [vmem:[#allocation8 + $0x10] sm:$0xff] }
 0x144   :  { %416 = vmatpush.bf16.msrb.mxu2 %v1441_v41  ;;  %v1446_v41 = vld [vmem:[#allocation8] sm:$0xff] }
 0x148   :  { %417 = vmatpush.bf16.msrb.mxu2 %v1440_v49 }
 0x14c   :  { %418 = vmatpush.bf16.msrb.mxu2 %v1439_v50 }
 0x150   :  { %419 = vmatpush.bf16.msrb.mxu2 %v1438_v51 }
 0x1b6   :  { %v242_v33 = vpop.f32.mrf.mxu2 }
 0x1be   :  { %v244_v34 = vpop.f32.mrf.mxu2 }
 0x1bf   :  { %v247_v35 = vpack.c.bf16 %v244_v34, %v242_v33  ;;  %v1453_v34 = vld [vmem:[#allocation8 + $0x38] sm:$0xff] }
 0x1c0   :  { %765 = vmatpush.bf16.msra.mxu1 %v1453_v34 }
 0x1c1   :  { %324 = vmatmul.bf16.vlgmr.msra.gmra.mxu3 %v247_v35  ;;  %v1452_v35 = vld [vmem:[#allocation8 + $0x30] sm:$0xff] }
 0x1c4   :  { %766 = vmatpush.bf16.msra.mxu1 %v1452_v35 }
 0x1c8   :  { %767 = vmatpush.bf16.msra.mxu1 %v1451_v36 }
 0x1cc   :  { %768 = vmatpush.bf16.msra.mxu1 %v1450_v37  ;;  %v1456_v37 = vld [vmem:[#allocation9 + $0x10] sm:$0xff] }
 0x1d0   :  { %769 = vmatpush.bf16.msra.mxu1 %v1449_v38  ;;  %v1455_v38 = vld [vmem:[#allocation9 + $0x8] sm:$0xff] }
 0x1d4   :  { %770 = vmatpush.bf16.msra.mxu1 %v1448_v39  ;;  %v1454_v39 = vld [vmem:[#allocation9] sm:$0xff] }
 0x244   :  { %v325_v40 = vpop.f32.mrf.mxu3 }
 0x245   :  { %v326_v43 = vadd.f32 %v1514_v42, %v325_v40  ;;  %v1447_v40 = vld [vmem:[#allocation8 + $0x8] sm:$0xff] }
 0x246   :  { %771 = vmatpush.bf16.msra.mxu1 %v1447_v40 }
 0x247   :  { %v330_v46 = vmax.f32 %v326_v43, 0.0 }
 0x24a   :  { %772 = vmatpush.bf16.msra.mxu1 %v1446_v41 }
 0x24c   :  { %v327_v44 = vpop.f32.mrf.mxu3 }
 0x24d   :  { %v328_v45 = vadd.f32 %v1514_v42, %v327_v44 }
 0x24f   :  { %v331_v47 = vmax.f32 %v328_v45, 0.0 }
 0x251   :  { %v332_v48 = vpack.c.bf16 %v331_v47, %v330_v46 }
 0x253   :  { %340 = vmatpush.bf16.msrb.mxu0 %v332_v48 }
 0x256   :  { %1282 = vmatmul.msk.bf16.vlgmr.msrb.gmra.mxu0 %vm115_vm0, %v1806_v6 }
 0x257   :  { %482 = vmatpush.bf16.msra.mxu0 %v332_v48 }
 0x2d3   :  { %v342_v52 = vpop.f32.mrf.mxu0 }
 0x2db   :  { %v344_v53 = vpop.f32.mrf.mxu0 }
 0x2dc   :  { %v347_v54 = vpack.c.bf16 %v344_v53, %v342_v52 }
 0x2de   :  { %420 = vmatmul.bf16.vlgmr.msrb.gmra.mxu2 %v347_v54 }
 0x361   :  { %v421_v57 = vpop.f32.mrf.mxu2 }
 0x362   :  { %v431_v58 = vsel %vm428_vm1, %v421_v57, -1e+30 }
 0x363   :  { %v433_v59 = vsel %vm115_vm0, %v431_v58, -inf }
 0x364   :  { %434 = vmax.xlane.f32.xlu0 %v433_v59 }
 0x369   :  { %v423_v60 = vpop.f32.mrf.mxu2 }
 0x36a   :  { %v432_v61 = vsel %vm428_vm1, %v423_v60, -1e+30 }
 0x36b   :  { %v436_v62 = vsel %vm115_vm0, %v432_v61, -inf }
 0x36c   :  { %437 = vmax.xlane.f32.xlu0 %v436_v62 }
 0x3d7   :  { %v1896_v63 = vpop.xlane.xlu0 %434 }
 0x3d8   :  { %v439_v0 = vsub.f32 %v431_v58, %v1896_v63 }
 0x3da   :  { %v441_v1 = vmul.f32 1.442695, %v439_v0 }
 0x3dc   :  { %1517 = vpow2.f32 %v441_v1 }
 0x3df   :  { %v1899_v3 = vpop.xlane.xlu0 %437 }
 0x3e0   :  { %v440_v5 = vsub.f32 %v432_v61, %v1899_v3 }
 0x3e2   :  { %v1518_v6 = vpop.eup %1517  ;;  %v443_v7 = vmul.f32 1.442695, %v440_v5 }
 0x3e3   :  { %v445_v8 = vsel %vm115_vm0, %v1518_v6, 0.0 }
 0x3e4   :  { %1519 = vpow2.f32 %v443_v7  ;;  %446 = vadd.xlane.f32.xlu1 %v445_v8 }
 0x3ea   :  { %v1520_v9 = vpop.eup %1519 }
 0x3eb   :  { %v448_v10 = vsel %vm115_vm0, %v1520_v9, 0.0 }
 0x3ec   :  { %449 = vadd.xlane.f32.xlu1 %v448_v10 }
 0x457   :  { %v1904_v11 = vpop.xlane.xlu1 %446 }
 0x458   :  { %1521 = vrcp.f32 %v1904_v11 }
 0x45e   :  { %v1522_v13 = vpop.eup %1521 }
 0x45f   :  { %v1907_v12 = vpop.xlane.xlu1 %449  ;;  %v453_v14 = vmul.f32 %v1522_v13, %v1518_v6 }
 0x460   :  { %1523 = vrcp.f32 %v1907_v12 }
 0x461   :  { %v599_v17 = vmul.f32 %v453_v14, %v431_v58 }
 0x463   :  { %v601_v20 = vsel %vm115_vm0, %v599_v17, 0.0 }
 0x466   :  { %v1524_v15 = vpop.eup %1523 }
 0x467   :  { %v454_v16 = vmul.f32 %v1524_v15, %v1520_v9 }
 0x469   :  { %v455_v18 = vpack.c.bf16 %v454_v16, %v453_v14  ;;  %v600_v19 = vmul.f32 %v454_v16, %v432_v61 }
 0x46b   :  { %456 = vxpose.xlu2.c.b16.start.end [1/1] (short) (narrow) %v455_v18, 16  ;;  %514 = vmatpush.bf16.msrb.mxu3 %v455_v18  ;;  %v602_v21 = vsel %vm115_vm0, %v600_v19, 0.0 }
 0x46c   :  { %528 = vmatpush.bf16.msrb.mxu0 %v455_v18  ;;  %v1912_v22 = vadd.f32 %v602_v21, %v601_v20  ;;  %v1461_v21 = vld [vmem:[#allocation9 + $0x38] sm:$0xff] }
 0x50c   :  { %v464_v23 = vpop.trf.xlu2 }
 0x50d   :  { %1315 = vmatmul.msk.bf16.vlgmr.msra.gmra.mxu0 %vm115_vm0, %v464_v23  ;;  %1316 = vmatmul.msk.bf16.vlgmr.msrb.gmra.mxu1 %vm115_vm0, %v464_v23 }
 0x50e   :  { %865 = vmatpush.bf16.msra.mxu0 %v1461_v21  ;;  %v114_v21 = vmul.f32 %v1799_v4, %v1799_v4 }
 0x51d   :  { %1318 = vmatmul.msk.bf16.vlgmr.msrb.gmra.mxu0 %vm115_vm0, %v464_v23  ;;  %v1460_v23 = vld [vmem:[#allocation9 + $0x30] sm:$0xff] }
 0x51e   :  { %866 = vmatpush.bf16.msra.mxu0 %v1460_v23 }
 0x58a   :  { %v484_v24 = vpop.f32.mrf.mxu0  ;;  %v498_v25 = vpop.f32.mrf.mxu1 }
 0x592   :  { %v486_v26 = vpop.f32.mrf.mxu0  ;;  %v500_v27 = vpop.f32.mrf.mxu1 }
 0x593   :  { %v678_v28 = vpack.c.bf16 %v486_v26, %v484_v24  ;;  %v503_v29 = vpack.c.bf16 %v500_v27, %v498_v25  ;;  %v1459_v24 = vld [vmem:[#allocation9 + $0x28] sm:$0xff]  ;;  %v1458_v25 = vld [vmem:[#allocation9 + $0x20] sm:$0xff]  ;;  %v1457_v27 = vld [vmem:[#allocation9 + $0x18] sm:$0xff] }
 0x594   :  { %867 = vmatpush.bf16.msra.mxu0 %v1459_v24 }
 0x595   :  { %1317 = vmatmul.msk.bf16.vlgmr.msrb.gmra.mxu3 %vm115_vm0, %v503_v29  ;;  %689 = vmatpush.bf16.msra.mxu2 %v678_v28  ;;  %v1515_v28 = vld [vmem:[%s2076_s8] ss:$0 sm:$0xff] }
 0x598   :  { %868 = vmatpush.bf16.msra.mxu0 %v1458_v25 }
 0x59c   :  { %869 = vmatpush.bf16.msra.mxu0 %v1457_v27 }
 0x5a0   :  { %870 = vmatpush.bf16.msra.mxu0 %v1456_v37 }
 0x5a4   :  { %871 = vmatpush.bf16.msra.mxu0 %v1455_v38 }
 0x5a8   :  { %872 = vmatpush.bf16.msra.mxu0 %v1454_v39 }
 0x618   :  { %v1918_v30 = vpop.f32.mrf.mxu3 }
 0x619   :  { %v625_v31 = vsel %vm115_vm0, %v1918_v30, 0.0 }
 0x61a   :  { %626 = vadd.xlane.f32.xlu2 %v625_v31 }
 0x620   :  { %v1922_v32 = vpop.f32.mrf.mxu3 }
 0x621   :  { %v628_v33 = vsel %vm115_vm0, %v1922_v32, 0.0 }
 0x622   :  { %629 = vadd.xlane.f32.xlu0 %v628_v33 }
 0x68d   :  { %v627_v42 = vpop.xlane.xlu2 %626 }
 0x68e   :  { %v631_v43 = vadd.f32 1e-09, %v627_v42 }
 0x690   :  { %1525 = vrcp.f32 %v631_v43  ;;  %v644_v50 = vand.u32 2147483648, %v631_v43  ;;  %vm638_vm3 = vweird.f32 %v631_v43  ;;  %v642_v52 = vand.u32 2147483647, %v631_v43 }
 0x692   :  { %v645_v58 = vor.u32 1.1754944e-38, %v644_v50  ;;  %vm643_vm5 = vcmp.eq.f32.partialorder %v642_v52, 8.507059e+37  ;;  %v1465_v50 = vld [vmem:[%s2079_s11 + $0x18] sm:$0xff] }
 0x695   :  { %v630_v44 = vpop.xlane.xlu0 %629 }
 0x696   :  { %v1526_v45 = vpop.eup %1525  ;;  %v632_v46 = vadd.f32 1e-09, %v630_v44  ;;  %v1469_v44 = vld [vmem:[%s2079_s11 + $0x38] sm:$0xff] }
 0x697   :  { %v634_v47 = vmul.f32 %v1526_v45, %v631_v43  ;;  %vm639_vm2 = vweird.f32 %v1526_v45  ;;  %v1942_v43 = vpop.f32.mrf.mxu0 }
 0x698   :  { %1527 = vrcp.f32 %v632_v46  ;;  %vm640_vm4 = vmor %vm638_vm3, %vm639_vm2  ;;  %v659_v60 = vand.u32 2147483648, %v632_v46  ;;  %v657_v0 = vand.u32 2147483647, %v632_v46  ;;  %vm653_vm7 = vweird.f32 %v632_v46 }
 0x699   :  { %v635_v48 = vsub.f32 1.0, %v634_v47  ;;  %v1467_v47 = vld [vmem:[%s2079_s11 + $0x28] sm:$0xff] }
 0x69a   :  { %v660_v6 = vor.u32 1.1754944e-38, %v659_v60  ;;  %vm658_vm9 = vcmp.eq.f32.partialorder %v657_v0, 8.507059e+37  ;;  %v1464_v60 = vld [vmem:[%s2079_s11 + $0x10] sm:$0xff] }
 0x69b   :  { %v636_v49 = vmul.f32 %v1526_v45, %v635_v48  ;;  %v1466_v48 = vld [vmem:[%s2079_s11 + $0x20] sm:$0xff] }
 0x69d   :  { %v637_v51 = vadd.f32 %v1526_v45, %v636_v49 }
 0x69e   :  { %v1528_v53 = vpop.eup %1527 }
 0x69f   :  { %v641_v54 = vsel %vm640_vm4, %v1526_v45, %v637_v51  ;;  %v649_v57 = vmul.f32 %v1528_v53, %v632_v46  ;;  %vm654_vm6 = vweird.f32 %v1528_v53  ;;  %v1468_v45 = vld [vmem:[%s2079_s11 + $0x30] sm:$0xff]  ;;  %v1950_v46 = vpop.f32.mrf.mxu0  ;;  %v1516_v51 = vld [vmem:[%s2078_s10] ss:$0 sm:$0xff] }
 0x6a0   :  { %v646_v61 = vsel %vm643_vm5, %v645_v58, %v641_v54  ;;  %vm655_vm8 = vmor %vm653_vm7, %vm654_vm6  ;;  %v557_v37 = vmul.f32 %v1950_v46, %v1950_v46 }
 0x6a1   :  { %v650_v59 = vsub.f32 1.0, %v649_v57  ;;  %v647_v5 = vmul.f32 %v646_v61, %v1918_v30  ;;  %v1463_v61 = vld [vmem:[%s2079_s11 + $0x8] sm:$0xff] }
 0x6a3   :  { %v651_v62 = vmul.f32 %v1528_v53, %v650_v59  ;;  %v663_v10 = vmul.f32 %v647_v5, %v647_v5 }
 0x6a5   :  { %v652_v1 = vadd.f32 %v1528_v53, %v651_v62  ;;  %v665_v15 = vsel %vm115_vm0, %v663_v10, 0.0  ;;  %v1462_v62 = vld [vmem:[%s2079_s11] sm:$0xff] }
 0x6a7   :  { %v656_v7 = vsel %vm655_vm8, %v1528_v53, %v652_v1 }
 0x6a8   :  { %v661_v8 = vsel %vm658_vm9, %v660_v6, %v656_v7 }
 0x6a9   :  { %v662_v9 = vmul.f32 %v661_v8, %v1922_v32 }
 0x6ab   :  { %v1928_v13 = vpack.c.bf16 %v662_v9, %v647_v5  ;;  %v664_v14 = vmul.f32 %v662_v9, %v662_v9 }
 0x6ad   :  { %1319 = vmatmul.msk.bf16.vlgmr.msra.gmra.mxu2 %vm115_vm0, %v1928_v13  ;;  %1051 = vmatpush.bf16.msrb.mxu1 %v1928_v13  ;;  %v666_v16 = vsel %vm115_vm0, %v664_v14, 0.0 }
 0x6ae   :  { %v1935_v17 = vadd.f32 %v666_v16, %v665_v15 }
 0x730   :  { %v691_v18 = vpop.f32.mrf.mxu2 }
 0x738   :  { %v693_v19 = vpop.f32.mrf.mxu2 }
 0x739   :  { %v696_v20 = vpack.c.bf16 %v693_v19, %v691_v18 }
 0x73b   :  { %773 = vmatmul.bf16.vlgmr.msra.gmra.mxu1 %v696_v20  ;;  %v113_v20 = vmul.f32 %v1797_v2, %v1797_v2 }
 0x73d   :  { %v116_v27 = vsel %vm115_vm0, %v113_v20, 0.0 }
 0x7b8   :  { %v774_v26 = vpop.f32.mrf.mxu1 }
 0x7b9   :  { %v775_v29 = vadd.f32 %v1515_v28, %v774_v26  ;;  %v1998_v26 = vshrl.u32 %v426_v55, 7 }
 0x7bb   :  { %v779_v34 = vmax.f32 %v775_v29, 0.0  ;;  %v2003_v29 = vadd.s32 8, %v1998_v26  ;;  %vm538_vm12 = vcmp.eq.s32.totalorder %v1998_v26, %v1891_v56 }
 0x7bd   :  { %vm539_vm11 = vcmp.eq.s32.totalorder %v2003_v29, %v1891_v56  ;;  %v1706_v56 = vmov 64.0  }
 0x7be   :  { %v541_v55 = vsel %vm539_vm11, %v1922_v32, 0.0 }
 0x7c0   :  { %v776_v31 = vpop.f32.mrf.mxu1 }
 0x7c1   :  { %v777_v33 = vadd.f32 %v1515_v28, %v776_v31  ;;  %v117_v28 = vsel %vm115_vm0, %v114_v21, 0.0 }
 0x7c2   :  { %v118_v2 = vadd.f32 %v117_v28, %v116_v27 }
 0x7c3   :  { %v780_v35 = vmax.f32 %v777_v33, 0.0  ;;  %v540_v33 = vsel %vm538_vm12, %v1918_v30, 0.0 }
 0x7c5   :  { %v781_v36 = vpack.c.bf16 %v780_v35, %v779_v34  ;;  %v543_v34 = vsel %vm115_vm0, %v541_v55, 0.0  ;;  %v542_v35 = vsel %vm115_vm0, %v540_v33, 0.0  ;;  %v1704_v55 = vmov 16.0  }
 0x7c7   :  { %789 = vmatpush.bf16.msra.mxu3 %v781_v36  ;;  %v544_v36 = vadd.f32 %v543_v34, %v542_v35 }
 0x7ca   :  { %1352 = vmatmul.msk.bf16.vlgmr.msra.gmra.mxu3 %vm115_vm0, %v1928_v13 }
 0x7cb   :  { %961 = vmatpush.bf16.msrb.mxu3 %v1469_v44 }
 0x7cf   :  { %962 = vmatpush.bf16.msrb.mxu3 %v1468_v45 }
 0x7d3   :  { %963 = vmatpush.bf16.msrb.mxu3 %v1467_v47 }
 0x7d7   :  { %964 = vmatpush.bf16.msrb.mxu3 %v1466_v48 }
 0x7db   :  { %965 = vmatpush.bf16.msrb.mxu3 %v1465_v50 }
 0x7df   :  { %966 = vmatpush.bf16.msrb.mxu3 %v1464_v60 }
 0x7e3   :  { %967 = vmatpush.bf16.msrb.mxu3 %v1463_v61 }
 0x7e7   :  { %968 = vmatpush.bf16.msrb.mxu3 %v1462_v62 }
 0x84d   :  { %v791_v40 = vpop.f32.mrf.mxu3 }
 0x855   :  { %v793_v41 = vpop.f32.mrf.mxu3 }
 0x856   :  { %v796_v42 = vpack.c.bf16 %v793_v41, %v791_v40  ;;  %v559_v40 = vsel %vm115_vm0, %v557_v37, 0.0 }
 0x858   :  { %873 = vmatmul.bf16.vlgmr.msra.gmra.mxu0 %v796_v42 }
 0x8d5   :  { %v874_v49 = vpop.f32.mrf.mxu0 }
 0x8d6   :  { %v875_v52 = vadd.f32 %v1516_v51, %v874_v49 }
 0x8d8   :  { %v879_v57 = vmax.f32 %v875_v52, 0.0 }
 0x8dd   :  { %v876_v53 = vpop.f32.mrf.mxu0 }
 0x8de   :  { %v877_v54 = vadd.f32 %v1516_v51, %v876_v53 }
 0x8e0   :  { %v880_v58 = vmax.f32 %v877_v54, 0.0 }
 0x8e2   :  { %v881_v59 = vpack.c.bf16 %v880_v58, %v879_v57 }
 0x8e4   :  { %889 = vmatpush.bf16.msrb.mxu2 %v881_v59 }
 0x8e7   :  { %1385 = vmatmul.msk.bf16.vlgmr.msrb.gmra.mxu2 %vm115_vm0, %v1928_v13 }
 0x8e8   :  { %1037 = vmatpush.bf16.msra.mxu2 %v881_v59 }
 0x96a   :  { %v891_v0 = vpop.f32.mrf.mxu2 }
 0x972   :  { %v893_v1 = vpop.f32.mrf.mxu2 }
 0x973   :  { %v896_v5 = vpack.c.bf16 %v893_v1, %v891_v0 }
 0x975   :  { %969 = vmatmul.bf16.vlgmr.msrb.gmra.mxu3 %v896_v5 }
 0x9f8   :  { %v970_v6 = vpop.f32.mrf.mxu3 }
 0x9f9   :  { %v1976_v7 = vsel %vm975_vm10, %v970_v6, -1e+30 }
 0x9fa   :  { %v980_v8 = vsel %vm115_vm0, %v1976_v7, -inf }
 0x9fb   :  { %981 = vmax.xlane.f32.xlu0 %v980_v8 }
 0xa00   :  { %v972_v9 = vpop.f32.mrf.mxu3 }
 0xa01   :  { %v1980_v10 = vsel %vm975_vm10, %v972_v9, -1e+30 }
 0xa02   :  { %v983_v13 = vsel %vm115_vm0, %v1980_v10, -inf }
 0xa03   :  { %984 = vmax.xlane.f32.xlu1 %v983_v13 }
 0xa6e   :  { %v1984_v14 = vpop.xlane.xlu0 %981 }
 0xa6f   :  { %v986_v15 = vsub.f32 %v1976_v7, %v1984_v14 }
 0xa71   :  { %v988_v16 = vmul.f32 1.442695, %v986_v15 }
 0xa73   :  { %1529 = vpow2.f32 %v988_v16 }
 0xa76   :  { %v1988_v18 = vpop.xlane.xlu1 %984 }
 0xa77   :  { %v987_v19 = vsub.f32 %v1980_v10, %v1988_v18 }
 0xa79   :  { %v1530_v23 = vpop.eup %1529  ;;  %v990_v24 = vmul.f32 1.442695, %v987_v19 }
 0xa7a   :  { %v992_v25 = vsel %vm115_vm0, %v1530_v23, 0.0 }
 0xa7b   :  { %1531 = vpow2.f32 %v990_v24  ;;  %993 = vadd.xlane.f32.xlu0 %v992_v25 }
 0xa7c   :  { %1533 = vlog2.f32 %v1907_v12  ;;  %v556_v12 = vmul.f32 %v1942_v43, %v1942_v43 }
 0xa7d   :  { %1535 = vlog2.f32 %v1904_v11 }
 0xa7e   :  { %v558_v41 = vsel %vm115_vm0, %v556_v12, 0.0 }
 0xa7f   :  { %v560_v42 = vadd.f32 %v559_v40, %v558_v41 }
 0xa81   :  { %v1532_v4 = vpop.eup %1531 }
 0xa82   :  { %v995_v31 = vsel %vm115_vm0, %v1532_v4, 0.0  ;;  %v1534_v38 = vpop.eup %1533 }
 0xa83   :  { %119 = vadd.xlane.f32.xlu0 %v118_v2  ;;  %996 = vadd.xlane.f32.xlu1 %v995_v31  ;;  %v1536_v32 = vpop.eup %1535  ;;  %v583_v39 = vmul.f32 0.6931472, %v1534_v38 }
 0xa84   :  { %v581_v30 = vmul.f32 0.6931472, %v1536_v32 }
 0xa85   :  { %v585_v11 = vadd.f32 %v583_v39, %v1899_v3  ;;  %v1703_v3 = vmov 256.0  }
 0xa86   :  { %v584_v44 = vadd.f32 %v581_v30, %v1896_v63 }
 0xa87   :  { %v588_v45 = vsel %vm586_vm13, %v585_v11, 0.0 }
 0xa88   :  { %v587_v46 = vsel %vm586_vm13, %v584_v44, 0.0 }
 0xa89   :  { %v589_v47 = vadd.f32 %v588_v45, %v587_v46 }
 0xa8b   :  { %545 = vadd.xlane.f32.xlu0 %v544_v36 }
 0xa93   :  { %561 = vadd.xlane.f32.xlu0 %v560_v42 }
 0xa9b   :  { %590 = vadd.xlane.f32.xlu0 %v589_v47 }
 0xaa3   :  { %604 = vadd.xlane.f32.xlu0 %v1912_v22 }
 0xaab   :  { %668 = vadd.xlane.f32.xlu0 %v1935_v17 }
 0xaee   :  { %v994_v43 = vpop.xlane.xlu0 %993 }
 0xaef   :  { %1537 = vrcp.f32 %v994_v43 }
 0xaf0   :  { %1539 = vlog2.f32 %v994_v43 }
 0xaf1   :  { %1541 = vrcp.f32 %v1703_v3 }
 0xaf5   :  { %v1538_v63 = vpop.eup %1537 }
 0xaf6   :  { %v120_v48 = vpop.xlane.xlu0 %119  ;;  %v997_v49 = vpop.xlane.xlu1 %996  ;;  %v1000_v57 = vmul.f32 %v1538_v63, %v1530_v23 }
 0xaf7   :  { %v121_v50 = vrot.slane %v120_v48, 4  ;;  %1543 = vrcp.f32 %v997_v49  ;;  %v1540_v52 = vpop.eup %1539 }
 0xaf8   :  { %1545 = vlog2.f32 %v997_v49  ;;  %v1542_v54 = vpop.eup %1541  ;;  %v1131_v22 = vmul.f32 0.6931472, %v1540_v52  ;;  %v1150_v8 = vmul.f32 %v1000_v57, %v1976_v7 }
 0xaf9   :  { %v122_v51 = vadd.f32 %v121_v50, %v120_v48  ;;  %v572_v6 = vmul.f32 256.0, %v1542_v54  ;;  %1547 = vrcp.f32 %v1704_v55  ;;  %vm576_vm14 = vweird.f32 %v1542_v54 }
 0xafa   :  { %v1134_v13 = vadd.f32 %v1131_v22, %v1984_v14  ;;  %v1152_v25 = vsel %vm115_vm0, %v1150_v8, 0.0  ;;  %1549 = vrcp.f32 %v1706_v56 }
 0xafb   :  { %v123_v53 = vrot.slane %v122_v51, 2  ;;  %v573_v24 = vsub.f32 1.0, %v572_v6 }
 0xafc   :  { %v1138_v7 = vsel %vm586_vm13, %v1134_v13, 0.0 }
 0xafd   :  { %v1544_v58 = vpop.eup %1543  ;;  %v124_v59 = vadd.f32 %v123_v53, %v122_v51  ;;  %v574_v35 = vmul.f32 %v1542_v54, %v573_v24 }
 0xafe   :  { %v1546_v17 = vpop.eup %1545  ;;  %v546_v60 = vpop.xlane.xlu0 %545  ;;  %v1001_v61 = vmul.f32 %v1544_v58, %v1532_v4 }
 0xaff   :  { %v1133_v62 = vmul.f32 0.6931472, %v1546_v17  ;;  %v547_v0 = vrot.slane %v546_v60, 4  ;;  %v125_v1 = vrot.slane %v124_v59, 1  ;;  %v575_v38 = vadd.f32 %v1542_v54, %v574_v35  ;;  %v1548_v12 = vpop.eup %1547 }
 0xb00   :  { %v1009_v5 = vmul.f32 0.0, %v1001_v61  ;;  %v615_v11 = vmul.f32 16.0, %v1548_v12  ;;  %vm619_vm15 = vweird.f32 %v1548_v12 }
 0xb01   :  { %v548_v9 = vadd.f32 %v547_v0, %v546_v60  ;;  %v1135_v15 = vadd.f32 %v1133_v62, %v1988_v18  ;;  %v126_v16 = vadd.f32 %v125_v1, %v124_v59  ;;  %v577_v42 = vsel %vm576_vm14, %v1542_v54, %v575_v38 }
 0xb02   :  { %v1010_v19 = vpack.c.bf16 %v1009_v5, %v1000_v57  ;;  %v1151_v20 = vmul.f32 %v1009_v5, %v1980_v10  ;;  %v616_v46 = vsub.f32 1.0, %v615_v11 }
 0xb03   :  { %v549_v21 = vrot.slane %v548_v9, 2  ;;  %v1137_v23 = vmul.f32 0.0, %v1135_v15  ;;  %1470 = vpush %v126_v16 }
 0xb04   :  { %1011 = vxpose.xlu1.c.b16.start.end [1/1] (short) (narrow) %v1010_v19, 16  ;;  %1069 = vmatpush.bf16.msrb.mxu0 %v1010_v19  ;;  %v1153_v27 = vsel %vm115_vm0, %v1151_v20, 0.0  ;;  %v617_v50 = vmul.f32 %v1548_v12, %v616_v46 }
 0xb05   :  { %1083 = vmatpush.bf16.msrb.mxu2 %v1010_v19  ;;  %v1139_v14 = vsel %vm586_vm13, %v1137_v23, 0.0  ;;  %v550_v18 = vadd.f32 %v549_v21, %v548_v9  ;;  %v2042_v28 = vadd.f32 %v1153_v27, %v1152_v25 }
 0xb06   :  { %v562_v2 = vpop.xlane.xlu0 %561  ;;  %v1140_v10 = vadd.f32 %v1139_v14, %v1138_v7  ;;  %v618_v52 = vadd.f32 %v1548_v12, %v617_v50 }
 0xb07   :  { %v563_v4 = vrot.slane %v562_v2, 4  ;;  %v551_v31 = vrot.slane %v550_v18, 1 }
 0xb08   :  { %1141 = vadd.xlane.f32.xlu0 %v1140_v10  ;;  %v620_v59 = vsel %vm619_vm15, %v1548_v12, %v618_v52 }
 0xb09   :  { %v564_v33 = vadd.f32 %v563_v4, %v562_v2  ;;  %v552_v34 = vadd.f32 %v551_v31, %v550_v18  ;;  %v1550_v4 = vpop.eup %1549 }
 0xb0b   :  { %v565_v36 = vrot.slane %v564_v33, 2  ;;  %1472 = vpush %v552_v34 }
 0xb0d   :  { %v566_v37 = vadd.f32 %v565_v36, %v564_v33  ;;  %v1122_v33 = vmul.f32 64.0, %v1550_v4 }
 0xb0e   :  { %v591_v32 = vpop.xlane.xlu0 %590 }
 0xb0f   :  { %v592_v39 = vrot.slane %v591_v32, 4  ;;  %v567_v40 = vrot.slane %v566_v37, 1  ;;  %v1123_v38 = vsub.f32 1.0, %v1122_v33 }
 0xb11   :  { %v593_v30 = vadd.f32 %v592_v39, %v591_v32  ;;  %v568_v41 = vadd.f32 %v567_v40, %v566_v37 }
 0xb13   :  { %v594_v44 = vrot.slane %v593_v30, 2  ;;  %1474 = vpush %v568_v41  ;;  %v1124_v41 = vmul.f32 %v1550_v4, %v1123_v38 }
 0xb14   :  { %1476 = vpush %v577_v42 }
 0xb15   :  { %v595_v45 = vadd.f32 %v594_v44, %v593_v30 }
 0xb16   :  { %v605_v47 = vpop.xlane.xlu0 %604 }
 0xb17   :  { %v606_v43 = vrot.slane %v605_v47, 4  ;;  %v596_v48 = vrot.slane %v595_v45, 1 }
 0xb19   :  { %v607_v49 = vadd.f32 %v606_v43, %v605_v47  ;;  %v597_v3 = vadd.f32 %v596_v48, %v595_v45  ;;  %v1125_v43 = vadd.f32 %v1550_v4, %v1124_v41 }
 0xb1b   :  { %v608_v63 = vrot.slane %v607_v49, 2  ;;  %1478 = vpush %v597_v3 }
 0xb1d   :  { %v609_v51 = vadd.f32 %v608_v63, %v607_v49 }
 0xb1e   :  { %v669_v53 = vpop.xlane.xlu0 %668 }
 0xb1f   :  { %v670_v57 = vrot.slane %v669_v53, 4  ;;  %v610_v54 = vrot.slane %v609_v51, 1 }
 0xb21   :  { %v671_v58 = vadd.f32 %v670_v57, %v669_v53  ;;  %v611_v22 = vadd.f32 %v610_v54, %v609_v51 }
 0xb23   :  { %v672_v17 = vrot.slane %v671_v58, 2  ;;  %1480 = vpush %v611_v22 }
 0xb24   :  { %1482 = vpush %v620_v59 }
 0xb25   :  { %v673_v60 = vadd.f32 %v672_v17, %v671_v58 }
 0xb27   :  { %v674_v61 = vrot.slane %v673_v60, 1 }
 0xb29   :  { %v675_v62 = vadd.f32 %v674_v61, %v673_v60 }
 0xb2b   :  { %1484 = vpush %v675_v62 }
 0xb34   :  { %s1471_s12 = spop %1470 }
 0xb7b   :  { %v1142_v29 = vpop.xlane.xlu0 %1141 }
 0xb7c   :  { %v1143_v31 = vrot.slane %v1142_v29, 4 }
 0xb7e   :  { %v1144_v34 = vadd.f32 %v1143_v31, %v1142_v29 }
 0xb80   :  { %v1145_v32 = vrot.slane %v1144_v34, 2 }
 0xb82   :  { %v1146_v11 = vadd.f32 %v1145_v32, %v1144_v34 }
 0xb84   :  { %v1147_v3 = vrot.slane %v1146_v11, 1 }
 0xb86   :  { %v1148_v54 = vadd.f32 %v1147_v3, %v1146_v11 }
 0xbb0   :  { %v1019_v0 = vpop.trf.xlu1 }
 0xbb1   :  { %1418 = vmatmul.msk.bf16.vlgmr.msra.gmra.mxu2 %vm115_vm0, %v1019_v0  ;;  %1419 = vmatmul.msk.bf16.vlgmr.msrb.gmra.mxu1 %vm115_vm0, %v1019_v0 }
 0xbc1   :  { %1421 = vmatmul.msk.bf16.vlgmr.msrb.gmra.mxu2 %vm115_vm0, %v1019_v0 }
 0xc2e   :  { %v1053_v1 = vpop.f32.mrf.mxu1 }
 0xc34   :  { %v1039_v5 = vpop.f32.mrf.mxu2 }
 0xc35   :  { %1176 = vst [vmem:[#allocation11] sm:$0xff] %v1039_v5 }
 0xc36   :  { %v1055_v6 = vpop.f32.mrf.mxu1 }
 0xc37   :  { %v1058_v8 = vpack.c.bf16 %v1055_v6, %v1053_v1 }
 0xc39   :  { %1420 = vmatmul.msk.bf16.vlgmr.msrb.gmra.mxu0 %vm115_vm0, %v1058_v8 }
 0xc3c   :  { %v1041_v9 = vpop.f32.mrf.mxu2 }
 0xc3d   :  { %1177 = vst [vmem:[#allocation11 + $0x8] sm:$0xff] %v1041_v9 }
 0xc3e   :  { %1192 = dma.vmem_to_hbm [thread:$0]  %s1185_s20, 256, %s1187_s18, [#allocation4], %s1696_s16, %s1696_s16, %s1697_s17  }
 0xc3f   :  { %s1473_s16 = spop %1472 }
 0xc40   :  { %s1475_s17 = spop %1474  ;;  %s554_s5 = smul.f32 2.0, %s1473_s16 }
 0xc41   :  { %s1477_s21 = spop %1476 }
 0xc42   :  { %s1479_s6 = spop %1478  ;;  %s555_s0 = ssub.f32 %s1471_s12, %s554_s5 }
 0xc43   :  { %s1481_s1 = spop %1480 }
 0xc44   :  { %v1085_v13 = vpop.f32.mrf.mxu2  ;;  %s1483_s8 = spop %1482  ;;  %s613_s3 = ssub.f32 %s1479_s6, %s1481_s1 }
 0xc45   :  { %v1106_v15 = vmul.f32 %v1085_v13, %v1085_v13  ;;  %s1485_s22 = spop %1484  ;;  %s570_s25 = sadd.f32 %s1475_s17, %s555_s0 }
 0xc46   :  { %s622_s28 = smul.f32 %s1483_s8, %s613_s3  ;;  %s1708_s17 = smov [#allocation12]  }
 0xc47   :  { %v1108_v21 = vsel %vm115_vm0, %v1106_v15, 0.0  ;;  %s579_s7 = smul.f32 %s1477_s21, %s570_s25 }
 0xc49   :  { %s624_s10 = sadd.f32 %s622_s28, %s579_s7 }
 0xc4c   :  { %v1087_v16 = vpop.f32.mrf.mxu2 }
 0xc4d   :  { %v1107_v19 = vmul.f32 %v1087_v16, %v1087_v16 }
 0xc4f   :  { %v1109_v20 = vsel %vm115_vm0, %v1107_v19, 0.0 }
 0xc50   :  { %v1110_v23 = vadd.f32 %v1109_v20, %v1108_v21 }
 0xc52   :  { %1111 = vadd.xlane.f32.xlu1 %v1110_v23 }
 0xcb6   :  { %v1071_v24 = vpop.f32.mrf.mxu0 }
 0xcb7   :  { %v1090_v25 = vsel %vm538_vm12, %v1071_v24, 0.0 }
 0xcb8   :  { %v1092_v14 = vsel %vm115_vm0, %v1090_v25, 0.0 }
 0xcbe   :  { %v1073_v27 = vpop.f32.mrf.mxu0 }
 0xcbf   :  { %v1091_v7 = vsel %vm539_vm11, %v1073_v27, 0.0 }
 0xcc0   :  { %v1093_v18 = vsel %vm115_vm0, %v1091_v7, 0.0  ;;  %vm1126_vm0 = vweird.f32 %v1550_v4 }
 0xcc1   :  { %v1094_v2 = vadd.f32 %v1093_v18, %v1092_v14  ;;  %v1127_v53 = vsel %vm1126_vm0, %v1550_v4, %v1125_v43 }
 0xcc3   :  { %1095 = vadd.xlane.f32.xlu0 %v1094_v2 }
 0xcc5   :  { %v1112_v26 = vpop.xlane.xlu1 %1111 }
 0xcc6   :  { %v1113_v10 = vrot.slane %v1112_v26, 4 }
 0xcc8   :  { %v1114_v55 = vadd.f32 %v1113_v10, %v1112_v26 }
 0xcca   :  { %v1115_v36 = vrot.slane %v1114_v55, 2 }
 0xccb   :  { %1155 = vadd.xlane.f32.xlu0 %v2042_v28  ;;  %v1707_v28 = vmov 8.0  }
 0xccc   :  { %1551 = vrcp.f32 %v1707_v28  ;;  %v1116_v30 = vadd.f32 %v1115_v36, %v1114_v55 }
 0xcce   :  { %v1117_v47 = vrot.slane %v1116_v30, 1 }
 0xcd0   :  { %v1118_v52 = vadd.f32 %v1117_v47, %v1116_v30 }
 0xcd2   :  { %v1552_v35 = vpop.eup %1551 }
 0xcd3   :  { %v1166_v40 = vmul.f32 8.0, %v1552_v35  ;;  %vm1170_vm1 = vweird.f32 %v1552_v35 }
 0xcd5   :  { %v1167_v45 = vsub.f32 1.0, %v1166_v40 }
 0xcd7   :  { %v1168_v51 = vmul.f32 %v1552_v35, %v1167_v45 }
 0xcd9   :  { %v1169_v22 = vadd.f32 %v1552_v35, %v1168_v51 }
 0xcdb   :  { %v1171_v60 = vsel %vm1170_vm1, %v1552_v35, %v1169_v22 }
 0xd36   :  { %v1096_v37 = vpop.xlane.xlu0 %1095 }
 0xd37   :  { %v1097_v12 = vrot.slane %v1096_v37, 4 }
 0xd39   :  { %v1098_v39 = vadd.f32 %v1097_v12, %v1096_v37 }
 0xd3b   :  { %v1099_v42 = vrot.slane %v1098_v39, 2 }
 0xd3d   :  { %v1100_v44 = vadd.f32 %v1099_v42, %v1098_v39 }
 0xd3e   :  { %v1156_v46 = vpop.xlane.xlu0 %1155 }
 0xd3f   :  { %v1157_v48 = vrot.slane %v1156_v46, 4  ;;  %v1101_v49 = vrot.slane %v1100_v44, 1 }
 0xd41   :  { %v1158_v50 = vadd.f32 %v1157_v48, %v1156_v46  ;;  %v1102_v63 = vadd.f32 %v1101_v49, %v1100_v44 }
 0xd43   :  { %v1159_v57 = vrot.slane %v1158_v50, 2  ;;  %1486 = vpush %v1102_v63 }
 0xd44   :  { %1488 = vpush %v1118_v52 }
 0xd45   :  { %v1160_v58 = vadd.f32 %v1159_v57, %v1158_v50  ;;  %1490 = vpush %v1127_v53 }
 0xd46   :  { %1492 = vpush %v1148_v54 }
 0xd47   :  { %v1161_v59 = vrot.slane %v1160_v58, 1 }
 0xd49   :  { %v1162_v17 = vadd.f32 %v1161_v59, %v1160_v58 }
 0xd4b   :  { %1494 = vpush %v1162_v17 }
 0xd4c   :  { %1496 = vpush %v1171_v60 }
 0xd74   :  { %s1487_s23 = spop %1486 }
 0xd75   :  { %s1104_s24 = smul.f32 2.0, %s1487_s23  ;;  %s1489_s27 = spop %1488 }
 0xd76   :  { %s1491_s4 = spop %1490 }
 0xd77   :  { %s1105_s26 = ssub.f32 %s1485_s22, %s1104_s24  ;;  %s1493_s9 = spop %1492 }
 0xd79   :  { %s1120_s29 = sadd.f32 %s1489_s27, %s1105_s26 }
 0xd7b   :  { %s1129_s30 = smul.f32 %s1491_s4, %s1120_s29 }
 0xd7c   :  { %s1495_s2 = spop %1494 }
 0xd7d   :  { %s1497_s14 = spop %1496  ;;  %s1164_s11 = ssub.f32 %s1493_s9, %s1495_s2 }
 0xd7e   :  { %s1174_s20 = sadd.f32 %s1129_s30, %s624_s10 }
 0xd7f   :  { %s1173_s12 = smul.f32 %s1497_s14, %s1164_s11 }
 0xd81   :  { %s1175_s16 = sadd.f32 %s1174_s20, %s1173_s12 }
 0xd83   :  { %1179 = sst [smem:[#allocation12]] %s1175_s16 }
 0xd84   :  { %1201 = dma.smem_to_hbm %s1708_s17, 16, %s1199_s19, [#allocation5]  }
 0xd85   :  { %1691 = dma.done.wait [#allocation4], 256  }
 0xd86   :  { %1692 = vsyncadd [#allocation4], 4294967040 }
 0xd87   :  { %1693 = dma.done.wait [#allocation5], 16  }
 0xd88   :  { %1694 = vsyncadd [#allocation5], 4294967280 }
 0xd89   :  { %1210 = sfence }
 0xd8a   :  { %1211 = vsyncpa [#allocation3], 1 }
 0xd8b   :  { %1212 = vsyncpa [#allocation7], 1 }
 0xd8c   :  { %1213 = vsyncpa [#allocation10], 1 }
 0xd8d   :  { %1214 = vsyncpa [#allocation4], 1 }
 0xd8e   :  { %1215 = vsyncpa [#allocation5], 1 }

</bundles_post_ra>
